<compile_context>
chip_gen: v7x
topology: tpu7x:2x2x1
jax: 0.10.0
libtpu: 0.0.40
codegen_flags: <defaults>
</compile_context>

<pallas_src>
import jax
import jax.numpy as jnp
from jax import lax
from jax.experimental import pallas as pl
from jax.experimental.pallas import tpu as pltpu

FEATURES = 784        # fixed by x.view(-1, 784) in get_loss
MAX_TILE_ROWS = 512   # rows per HBM->VMEM block (512*784*4B ~ 1.6 MB f32 per input)
CHUNK = 32            # rows folded per fori_loop step (multiple of 32: safe for any dtype packing)


def _round_up(v, m):
    return (v + m - 1) // m * m


def _num_tensorcores():
    """v7x exposes 2 TensorCores per Pallas device; v5e/v6e have 1."""
    try:
        kind = jax.devices()[0].device_kind.lower()
    except Exception:
        return 1
    if "v5" in kind or "v6" in kind:
        return 1
    if "7" in kind:
        return 2
    return 1


def _pick_chunk(tile_rows):
    for c in (CHUNK, 16, 8):
        if c <= tile_rows and tile_rows % c == 0:
            return c
    return tile_rows


def _make_kernel(*, rows, tile_rows, tiles_per_split, chunk, feat, needs_mask):
    n_chunks = tile_rows // chunk

    def kernel(recon_ref, x_ref, out_ref):
        c = pl.program_id(0)   # core split (parallel)
        i = pl.program_id(1)   # tile within split (arbitrary; accumulator resident)

        @pl.when(i == 0)
        def _():
            out_ref[...] = jnp.zeros_like(out_ref)

        # Logical (un-clamped) first row of this tile — used only for masking.
        tile_row0 = (c * tiles_per_split + i) * tile_rows

        def chunk_body(k, acc):
            r0 = pl.multiple_of(k * chunk, chunk)
            r = recon_ref[pl.ds(r0, chunk), :].astype(jnp.float32)
            xv = x_ref[pl.ds(r0, chunk), :].astype(jnp.float32)
            # PyTorch's binary_cross_entropy clamps both log terms at -100
            # (handles exact 0/1 probabilities); log/log1p go to the EUP slot.
            log_r = jnp.maximum(jnp.log(r), -100.0)
            log_1mr = jnp.maximum(jnp.log1p(-r), -100.0)
            # x*log(r) + (1-x)*log(1-r), rewritten to save VALU ops; the final
            # negation happens once, on the scalar result, in the wrapper.
            contrib = xv * (log_r - log_1mr) + log_1mr
            if needs_mask:
                # Rows past the real array end (partial last block / clamped
                # duplicate tile of an uneven split) contribute exactly 0.
                row_ids = lax.broadcasted_iota(jnp.int32, (chunk, 1), 0)
                valid = (tile_row0 + r0 + row_ids) < rows
                contrib = jnp.where(valid, contrib, 0.0)
            # Fold the chunk's rows into the (8, feat) accumulator with pure
            # elementwise vreg adds (the 8-row groups align with (8,128) tiles).
            return acc + contrib.reshape(chunk // 8, 8, feat).sum(axis=0)

        acc = lax.fori_loop(0, n_chunks, chunk_body,
                            jnp.zeros((8, feat), jnp.float32), unroll=True)
        out_ref[...] += acc

    return kernel


def bce_loss_sum(recon_x, x, *, max_tile_rows=MAX_TILE_ROWS):
    """Pallas equivalent of BaseModel.get_loss(recon_x, x): sum-reduced BCE."""
    x2d = x.reshape(-1, FEATURES)          # mirrors x.view(-1, 784) (free reshape)
    r2d = recon_x.reshape(-1, FEATURES)
    if x2d.shape[0] != r2d.shape[0]:
        raise ValueError("recon_x and x must contain the same number of elements")
    rows = x2d.shape[0]

    num_splits = _num_tensorcores()
    rows_per_split = pl.cdiv(rows, num_splits)
    if rows_per_split <= max_tile_rows and rows % (8 * num_splits) == 0:
        tile_rows = rows // num_splits     # exact fit: no masking, no clipping
    else:
        tile_rows = min(max_tile_rows, _round_up(rows_per_split, CHUNK))

    n_tiles = pl.cdiv(rows, tile_rows)
    if n_tiles < num_splits:
        num_splits = 1
    tiles_per_split = pl.cdiv(n_tiles, num_splits)
    chunk = _pick_chunk(tile_rows)
    # Masking (instead of padding) keeps HBM traffic at exactly the input size;
    # only needed when the last tile is partial or the split is uneven.
    needs_mask = (rows % tile_rows != 0) or (n_tiles % num_splits != 0)

    last_tile = n_tiles - 1

    def in_index_map(c, i):
        # Clamp so an uneven split never asks for a block past the array end;
        # the duplicated block's contribution is masked to 0 in the kernel.
        return (jnp.minimum(c * tiles_per_split + i, last_tile), 0)

    kernel = _make_kernel(rows=rows, tile_rows=tile_rows,
                          tiles_per_split=tiles_per_split, chunk=chunk,
                          feat=FEATURES, needs_mask=needs_mask)

    in_bytes = r2d.size * r2d.dtype.itemsize + x2d.size * x2d.dtype.itemsize
    cost = pl.CostEstimate(
        flops=6 * r2d.size,
        transcendentals=2 * r2d.size,
        bytes_accessed=in_bytes + num_splits * 8 * FEATURES * 4,
    )

    partials = pl.pallas_call(
        kernel,
        out_shape=jax.ShapeDtypeStruct((num_splits * 8, FEATURES), jnp.float32),
        grid_spec=pltpu.PrefetchScalarGridSpec(
            num_scalar_prefetch=0,
            grid=(num_splits, tiles_per_split),
            in_specs=[
                pl.BlockSpec((tile_rows, FEATURES), in_index_map),
                pl.BlockSpec((tile_rows, FEATURES), in_index_map),
            ],
            # One (8, 784) accumulator slab per core split; its block index only
            # depends on the core axis, so it stays resident across tiles.
            out_specs=pl.BlockSpec((8, FEATURES), lambda c, i: (c, 0)),
        ),
        compiler_params=pltpu.CompilerParams(
            dimension_semantics=("parallel", "arbitrary"),
            # 2 inputs x 2 pipeline buffers x <=1.75 MiB blocks << 32 MiB; safe
            # on v5e/v6e (128 MiB VMEM) and well under v7x's 64 MiB per TC.
            vmem_limit_bytes=32 * 1024 * 1024,
        ),
        cost_estimate=cost,
    )(r2d, x2d)

    # Kernel accumulates +[x*log(r) + (1-x)*log(1-r)]; BCE-sum is its negation.
    # Final tiny cross-lane/core reduction is done in XLA.
    return -jnp.sum(partials)


class BaseModelPallas:
    """JAX/Pallas counterpart of the (abstract) PyTorch BaseModel."""

    def __init__(self):
        # BaseModel.__init__ creates no parameters.
        pass

    def forward(self, x):
        # TODO(synk): BaseModel.forward is `pass` (abstract) in PyTorch; nothing to compute.
        return None

    def __call__(self, x):
        return self.forward(x)

    @staticmethod
    def get_loss(recon_x, x):
        return bce_loss_sum(recon_x, x)

    # TODO(synk): __str__ / save_img are filesystem image-I/O utilities with no Pallas equivalent.


def _reference_bce_sum(recon_x, x):
    xr = x.reshape(-1, FEATURES).astype(jnp.float32)
    rr = recon_x.reshape(-1, FEATURES).astype(jnp.float32)
    return -jnp.sum(
        xr * jnp.maximum(jnp.log(rr), -100.0)
        + (1.0 - xr) * jnp.maximum(jnp.log1p(-rr), -100.0)
    )


if __name__ == "__main__":
    key = jax.random.PRNGKey(0)
    k1, k2, k3, k4 = jax.random.split(key, 4)

    model = BaseModelPallas()

    # Test A: small batch, exact-fit single tile (no masking path).
    batch_a = 16
    x_a = jax.random.uniform(k1, (batch_a, 1, 28, 28), dtype=jnp.float32)
    recon_a = jax.nn.sigmoid(jax.random.normal(k2, (batch_a, FEATURES), dtype=jnp.float32))
    loss_a = model.get_loss(recon_a, x_a)
    jax.block_until_ready(loss_a)
    ref_a = _reference_bce_sum(recon_a, x_a)
    assert jnp.allclose(loss_a, ref_a, rtol=1e-5, atol=1e-3), (loss_a, ref_a)

    # Test B: multi-tile grid with a partial (masked) last tile, using a small
    # tile cap so the accumulate-across-tiles + masking paths are exercised.
    batch_b = 72
    x_b = jax.random.uniform(k3, (batch_b, 1, 28, 28), dtype=jnp.float32)
    recon_b = jax.nn.sigmoid(jax.random.normal(k4, (batch_b, FEATURES), dtype=jnp.float32))
    loss_b = bce_loss_sum(recon_b, x_b, max_tile_rows=32)
    jax.block_until_ready(loss_b)
    ref_b = _reference_bce_sum(recon_b, x_b)
    assert jnp.allclose(loss_b, ref_b, rtol=1e-5, atol=1e-3), (loss_b, ref_b)

    print("KERNEL_OK")
</pallas_src>

<mosaic_0001>
module attributes {stable_mosaic.version = 11 : i64} {
  func.func @kernel(%arg0: i32, %arg1: i32, %arg2: memref<16x784xf32, #tpu.memory_space<vmem>>, %arg3: memref<16x784xf32, #tpu.memory_space<vmem>>, %arg4: memref<8x784xf32, #tpu.memory_space<vmem>>) attributes {dimension_semantics = [#tpu.dimension_semantics<parallel>, #tpu.dimension_semantics<arbitrary>], iteration_bounds = array<i64: 1, 1>, scalar_prefetch = 0 : i64, scratch_operands = 0 : i64, tpu.core_type = #tpu.core_type<tc>, window_params = [{transform_indices = @transform_0, window_bounds = array<i64: 16, 784>}, {transform_indices = @transform_1, window_bounds = array<i64: 16, 784>}, {transform_indices = @transform_2, window_bounds = array<i64: 8, 784>}]} {
    %c0_i32 = arith.constant 0 : i32
    %0 = arith.cmpi eq, %arg1, %c0_i32 : i32
    %1 = arith.extui %0 : i1 to i32
    %c0_i32_0 = arith.constant 0 : i32
    %2 = arith.cmpi ne, %1, %c0_i32_0 : i32
    scf.if %2 {
      %cst_11 = arith.constant 0.000000e+00 : f32
      %27 = vector.broadcast %cst_11 : f32 to vector<8x784xf32>
      %c0_12 = arith.constant 0 : index
      %c0_13 = arith.constant 0 : index
      %28 = vector.load %arg4[%c0_12, %c0_13] : memref<8x784xf32, #tpu.memory_space<vmem>>, vector<8x784xf32>
      tpu.vector_store %arg4[%c0_12, %c0_13], %27 {strides = array<i32>} : memref<8x784xf32, #tpu.memory_space<vmem>>, vector<8x784xf32>,
    } else {
    }
    %cst = arith.constant 0.000000e+00 : f32
    %3 = vector.broadcast %cst : f32 to vector<8x784xf32>
    %c0_i32_1 = arith.constant 0 : i32
    %c16_i32 = arith.constant 16 : i32
    %4 = arith.muli %c0_i32_1, %c16_i32 : i32
    %5 = tpu.assume_multiple %4, 16 : i32
    %6 = arith.index_cast %5 : i32 to index
    %c0 = arith.constant 0 : index
    %7 = vector.load %arg2[%6, %c0] : memref<16x784xf32, #tpu.memory_space<vmem>>, vector<16x784xf32>
    %8 = arith.index_cast %5 : i32 to index
    %c0_2 = arith.constant 0 : index
    %9 = vector.load %arg3[%8, %c0_2] : memref<16x784xf32, #tpu.memory_space<vmem>>, vector<16x784xf32>
    %10 = math.log %7 : vector<16x784xf32>
    %cst_3 = arith.constant -1.000000e+02 : f32
    %11 = vector.broadcast %cst_3 : f32 to vector<16x784xf32>
    %12 = arith.maximumf %10, %11 : vector<16x784xf32>
    %cst_4 = arith.constant 0.000000e+00 : f32
    %13 = vector.broadcast %cst_4 : f32 to vector<16x784xf32>
    %14 = arith.subf %13, %7 : vector<16x784xf32>
    %15 = math.log1p %14 : vector<16x784xf32>
    %cst_5 = arith.constant -1.000000e+02 : f32
    %16 = vector.broadcast %cst_5 : f32 to vector<16x784xf32>
    %17 = arith.maximumf %15, %16 : vector<16x784xf32>
    %18 = arith.subf %12, %17 : vector<16x784xf32>
    %19 = arith.mulf %9, %18 : vector<16x784xf32>
    %20 = arith.addf %19, %17 : vector<16x784xf32>
    %21 = vector.shape_cast %20 : vector<16x784xf32> to vector<2x8x784xf32>
    %cst_6 = arith.constant dense<0.000000e+00> : vector<8x784xf32>
    %22 = vector.multi_reduction <add>, %21, %cst_6 [0] : vector<2x8x784xf32> to vector<8x784xf32>
    %23 = arith.addf %3, %22 : vector<8x784xf32>
    %c1_i32 = arith.constant 1 : i32
    %c0_7 = arith.constant 0 : index
    %c0_8 = arith.constant 0 : index
    %24 = vector.load %arg4[%c0_7, %c0_8] : memref<8x784xf32, #tpu.memory_space<vmem>>, vector<8x784xf32>
    %25 = arith.addf %24, %23 : vector<8x784xf32>
    %c0_9 = arith.constant 0 : index
    %c0_10 = arith.constant 0 : index
    %26 = vector.load %arg4[%c0_9, %c0_10] : memref<8x784xf32, #tpu.memory_space<vmem>>, vector<8x784xf32>
    tpu.vector_store %arg4[%c0_9, %c0_10], %25 {strides = array<i32>} : memref<8x784xf32, #tpu.memory_space<vmem>>, vector<8x784xf32>,
    return
  }
  func.func @transform_0(%arg0: i32, %arg1: i32) -> (i32, i32) {
    %c1_i32 = arith.constant 1 : i32
    %0 = arith.muli %arg0, %c1_i32 : i32
    %1 = arith.addi %0, %arg1 : i32
    %c0_i32 = arith.constant 0 : i32
    %2 = arith.minsi %1, %c0_i32 : i32
    %c0_i32_0 = arith.constant 0 : i32
    %c0_i32_1 = arith.constant 0 : i32
    return %2, %c0_i32_0 : i32, i32
  }
  func.func @transform_1(%arg0: i32, %arg1: i32) -> (i32, i32) {
    %c1_i32 = arith.constant 1 : i32
    %0 = arith.muli %arg0, %c1_i32 : i32
    %1 = arith.addi %0, %arg1 : i32
    %c0_i32 = arith.constant 0 : i32
    %2 = arith.minsi %1, %c0_i32 : i32
    %c0_i32_0 = arith.constant 0 : i32
    %c0_i32_1 = arith.constant 0 : i32
    return %2, %c0_i32_0 : i32, i32
  }
  func.func @transform_2(%arg0: i32, %arg1: i32) -> (i32, i32) {
    %c0_i32 = arith.constant 0 : i32
    %c0_i32_0 = arith.constant 0 : i32
    return %arg0, %c0_i32 : i32, i32
  }
}

</mosaic_0001>

<bundles_post_ra>
// kernel: tpu_custom_call.1
= control target key start
LH: loop header
LB: loop body
LE: loop exit
PB: predicated region body
PF: predicated region fallthrough
CT: control target
= control target key end

     0   :  { %7 = vsyncpa [#allocation3], 0  ;;  %s700_s0 = inlined_call_operand.hbm [shape: f32[16,784], index: 0, kind: input, shape index: {}]   ;;  %s701_s1 = inlined_call_operand.hbm [shape: f32[16,784], index: 1, kind: input, shape index: {}]   ;;  %s702_s2 = inlined_call_operand.hbm [shape: f32[8,784], index: 2, kind: output, shape index: {}]  }
   0x1   :  { %8 = vsyncpa [#allocation6], 0 }
   0x2   :  { %9 = vsyncpa [#allocation4], 0  ;;  %s537_s9 = smov [#allocation2]   ;;  %s465_s13 = scalar_lea.hbm %s700_s0, 1792 }
   0x3   :  { %s22_s10 = sshll.u32 %s537_s9, 4  ;;  %p466_p0 = scmp.ne.s32.totalorder %s700_s0, %s465_s13  ;;  %s23_s10 = int_to_ptr.vmem [resolvable:$true] %s22_s10 }
   0x4   :  { %p469_p1 = scmp.lt.u32.totalorder %s465_s13, %s700_s0 }
   0x6   :  { %p471_p2 = pnand %p469_p1, %p466_p0 }
   0x8   :  { %474 = shalt.err (!%p471_p2)
}
   0x9   :  { %s475_s18 = scalar_lea.vmem %s23_s10, 1792  ;;  %p480_p4 = scmp.lt.s32.totalorder %s23_s10, %s23_s10 }
   0xa   :  { %p476_p3 = scmp.ne.s32.totalorder %s23_s10, %s475_s18  ;;  %p481_p5 = scmp.lt.s32.totalorder %s475_s18, %s475_s18 }
   0xc   :  { %p482_p6 = por %p481_p5, %p480_p4 }
   0xe   :  { %p483_p7 = pnand %p482_p6, %p476_p3 }
  0x10   :  { %486 = shalt.err (!%p483_p7)
}
  0x11   :  { %s538_s19 = smov 896   ;;  %s539_s20 = smov 56  }
  0x12   :  { %28 = dma.hbm_to_vmem [thread:$0]  %s700_s0, 1792, %s23_s10, [#allocation3], %s538_s19, %s538_s19, %s539_s20  }
  0x13   :  { %s540_s23 = smov [#allocation5]   ;;  %s487_s27 = scalar_lea.hbm %s701_s1, 1792 }
  0x14   :  { %s41_s24 = sshll.u32 %s540_s23, 4  ;;  %p488_p8 = scmp.ne.s32.totalorder %s701_s1, %s487_s27  ;;  %s42_s24 = int_to_ptr.vmem [resolvable:$true] %s41_s24 }
  0x15   :  { %p491_p9 = scmp.lt.u32.totalorder %s487_s27, %s701_s1 }
  0x17   :  { %p493_p10 = pnand %p491_p9, %p488_p8 }
  0x19   :  { %496 = shalt.err (!%p493_p10)
}
  0x1a   :  { %s497_s4 = scalar_lea.vmem %s42_s24, 1792  ;;  %p502_p12 = scmp.lt.s32.totalorder %s42_s24, %s42_s24 }
  0x1b   :  { %p498_p11 = scmp.ne.s32.totalorder %s42_s24, %s497_s4  ;;  %p503_p13 = scmp.lt.s32.totalorder %s497_s4, %s497_s4 }
  0x1d   :  { %p504_p0 = por %p503_p13, %p502_p12 }
  0x1f   :  { %p505_p1 = pnand %p504_p0, %p498_p11 }
  0x21   :  { %508 = shalt.err (!%p505_p1)
}
  0x22   :  { %47 = dma.hbm_to_vmem [thread:$0]  %s701_s1, 1792, %s42_s24, [#allocation6], %s538_s19, %s538_s19, %s539_s20  }
  0x23   :  { %531 = dma.done.wait [#allocation3], 1792  }
  0x24   :  { %532 = vsyncadd [#allocation3], 4294965504 }
  0x25   :  { %533 = dma.done.wait [#allocation6], 1792  }
  0x26   :  { %534 = vsyncadd [#allocation6], 4294965504  ;;  %vm72_vm0 = vcmask 130048   ;;  %v541_v0 = vmov 0.0   ;;  %v83_v1 = vld [vmem:[#allocation2 + $0x30] sm:$0xff]  ;;  %v90_v2 = vld [vmem:[#allocation2 + $0x68] sm:$0xff] }
  0x27   :  { %73 = vst.msk [vmem:[#allocation7 + $0x30] sm:$0xff] %vm72_vm0, %v541_v0  ;;  %409 = vlog2.f32 %v83_v1  ;;  %v155_v3 = vsub.f32 0.0, %v83_v1  ;;  %v162_v4 = vsub.f32 0.0, %v90_v2  ;;  %v77_v5 = vld [vmem:[#allocation2] sm:$0xff]  ;;  %v84_v6 = vld [vmem:[#allocation2 + $0x38] sm:$0xff]  ;;  %v78_v19 = vld [vmem:[#allocation2 + $0x8] sm:$0xff] }
  0x28   :  { %411 = vlog2.f32 %v90_v2  ;;  %v149_v7 = vsub.f32 0.0, %v77_v5  ;;  %v156_v8 = vsub.f32 0.0, %v84_v6  ;;  %v85_v22 = vld [vmem:[#allocation2 + $0x40] sm:$0xff]  ;;  %v150_v28 = vsub.f32 0.0, %v78_v19  ;;  %v79_v36 = vld [vmem:[#allocation2 + $0x10] sm:$0xff]  ;;  %v86_v54 = vld [vmem:[#allocation2 + $0x48] sm:$0xff] }
  0x29   :  { %v217_v9 = vadd.f32 1.0, %v155_v3  ;;  %v220_v10 = vmul.f32 -0.5, %v155_v3  ;;  %v223_v11 = vand.u32 2147483647, %v155_v3  ;;  %v280_v12 = vadd.f32 1.0, %v162_v4  ;;  %v106_v20 = vld [vmem:[#allocation5 + $0x68] sm:$0xff] }
  0x2a   :  { %v283_v13 = vmul.f32 -0.5, %v162_v4  ;;  %v286_v14 = vand.u32 2147483647, %v162_v4  ;;  %413 = vlog2.f32 %v77_v5  ;;  %v163_v15 = vadd.f32 1.0, %v149_v7  ;;  %v100_v29 = vld [vmem:[#allocation5 + $0x38] sm:$0xff]  ;;  %s542_s1 = smov [#allocation7]  }
  0x2b   :  { %415 = vlog2.f32 %v217_v9  ;;  %v221_v16 = vadd.f32 1.0, %v220_v10  ;;  %v166_v17 = vmul.f32 -0.5, %v149_v7  ;;  %v169_v18 = vand.u32 2147483647, %v149_v7  ;;  %s389_s6 = sshll.u32 %s542_s1, 4  ;;  %s390_s6 = int_to_ptr.vmem [resolvable:$true] %s389_s6 }
  0x2c   :  { %417 = vlog2.f32 %v280_v12  ;;  %vm583_vm1 = vcmp.lt.f32.partialorder %v223_v11, 0.0004427343  ;;  %v226_v21 = vadd.f32 1.0, %v156_v8  ;;  %v284_v23 = vadd.f32 1.0, %v283_v13  ;;  %s509_s7 = scalar_lea.vmem %s390_s6, 896  ;;  %p514_p3 = scmp.lt.s32.totalorder %s390_s6, %s390_s6 }
  0x2d   :  { %419 = vlog2.f32 %v84_v6  ;;  %vm587_vm2 = vcmp.lt.f32.partialorder %v286_v14, 0.0004427343  ;;  %v229_v25 = vmul.f32 -0.5, %v156_v8  ;;  %v222_v26 = vmul.f32 %v221_v16, %v155_v3  ;;  %p510_p2 = scmp.ne.s32.totalorder %s390_s6, %s509_s7  ;;  %p515_p4 = scmp.lt.s32.totalorder %s509_s7, %s509_s7 }
  0x2e   :  { %421 = vlog2.f32 %v163_v15  ;;  %v167_v27 = vadd.f32 1.0, %v166_v17  ;;  %vm591_vm3 = vcmp.lt.f32.partialorder %v169_v18, 0.0004427343  ;;  %v232_v30 = vand.u32 2147483647, %v156_v8  ;;  %v99_v15 = vld [vmem:[#allocation5 + $0x30] sm:$0xff] }
  0x2f   :  { %423 = vlog2.f32 %v226_v21  ;;  %v595_v31 = vsub.f32 0.0, %v85_v22  ;;  %v230_v33 = vadd.f32 1.0, %v229_v25  ;;  %v172_v34 = vadd.f32 1.0, %v150_v28  ;;  %p516_p5 = por %p515_p4, %p514_p3 }
  0x30   :  { %425 = vlog2.f32 %v78_v19  ;;  %v175_v35 = vmul.f32 -0.5, %v150_v28  ;;  %v285_v39 = vmul.f32 %v284_v23, %v162_v4  ;;  %v178_v40 = vand.u32 2147483647, %v150_v28 }
  0x31   :  { %v410_v32 = vpop.eup %409  ;;  %427 = vlog2.f32 %v85_v22  ;;  %v235_v41 = vadd.f32 1.0, %v595_v31  ;;  %v238_v44 = vmul.f32 -0.5, %v595_v31  ;;  %v168_v46 = vmul.f32 %v167_v27, %v149_v7  ;;  %p517_p6 = pnand %p516_p5, %p510_p2 }
  0x32   :  { %v412_v37 = vpop.eup %411  ;;  %v120_v38 = vmul.f32 0.6931472, %v410_v32  ;;  %429 = vlog2.f32 %v172_v34  ;;  %v176_v43 = vadd.f32 1.0, %v175_v35  ;;  %v241_v47 = vand.u32 2147483647, %v595_v31 }
  0x33   :  { %v134_v42 = vmul.f32 0.6931472, %v412_v37  ;;  %431 = vlog2.f32 %v235_v41  ;;  %v600_v48 = vsub.f32 0.0, %v79_v36  ;;  %v231_v52 = vmul.f32 %v230_v33, %v156_v8 }
  0x34   :  { %v414_v45 = vpop.eup %413  ;;  %v141_v50 = vmax.f32 %v120_v38, -100.0  ;;  %vm602_vm4 = vcmp.lt.f32.partialorder %v232_v30, 0.0004427343  ;;  %vm606_vm5 = vcmp.lt.f32.partialorder %v178_v40, 0.0004427343  ;;  %433 = vlog2.f32 %v79_v36 }
  0x35   :  { %v416_v49 = vpop.eup %415  ;;  %v108_v51 = vmul.f32 0.6931472, %v414_v45  ;;  %v148_v56 = vmax.f32 %v134_v42, -100.0  ;;  %v177_v61 = vmul.f32 %v176_v43, %v150_v28  ;;  %v239_v62 = vadd.f32 1.0, %v238_v44 }
  0x36   :  { %v418_v55 = vpop.eup %417  ;;  %v219_v57 = vmul.f32 0.6931472, %v416_v49  ;;  %vm610_vm6 = vcmp.lt.f32.partialorder %v241_v47, 0.0004427343  ;;  %v616_v3 = vsub.f32 0.0, %v86_v54  ;;  %v181_v4 = vadd.f32 1.0, %v600_v48 }
  0x37   :  { %v420_v59 = vpop.eup %419  ;;  %v282_v60 = vmul.f32 0.6931472, %v418_v55  ;;  %v135_v8 = vmax.f32 %v108_v51, -100.0  ;;  %v184_v13 = vmul.f32 -0.5, %v600_v48  ;;  %v240_v28 = vmul.f32 %v239_v62, %v595_v31  ;;  %v101_v55 = vld [vmem:[#allocation5 + $0x40] sm:$0xff] }
  0x38   :  { %v422_v0 = vpop.eup %421  ;;  %v225_v1 = vsel %vm583_vm1, %v222_v26, %v219_v57  ;;  %v122_v2 = vmul.f32 0.6931472, %v420_v59  ;;  %435 = vlog2.f32 %v181_v4  ;;  %v93_v26 = vld [vmem:[#allocation5] sm:$0xff]  ;;  %v187_v30 = vand.u32 2147483647, %v600_v48 }
  0x39   :  { %v424_v5 = vpop.eup %423  ;;  %v288_v6 = vsel %vm587_vm2, %v285_v39, %v282_v60  ;;  %v295_v7 = vmax.f32 %v225_v1, -100.0  ;;  %v165_v9 = vmul.f32 0.6931472, %v422_v0  ;;  %437 = vlog2.f32 %v86_v54 }
  0x3a   :  { %v426_v10 = vpop.eup %425  ;;  %v302_v11 = vmax.f32 %v288_v6, -100.0  ;;  %v228_v12 = vmul.f32 0.6931472, %v424_v5  ;;  %v142_v17 = vmax.f32 %v122_v2, -100.0  ;;  %v185_v36 = vadd.f32 1.0, %v184_v13  ;;  %v80_v2 = vld [vmem:[#allocation2 + $0x18] sm:$0xff] }
  0x3b   :  { %v428_v14 = vpop.eup %427  ;;  %v309_v16 = vsub.f32 %v141_v50, %v295_v7  ;;  %v171_v18 = vsel %vm591_vm3, %v168_v46, %v165_v9  ;;  %v110_v19 = vmul.f32 0.6931472, %v426_v10  ;;  %v244_v31 = vadd.f32 1.0, %v616_v3  ;;  %v94_v50 = vld [vmem:[#allocation5 + $0x8] sm:$0xff]  ;;  %v87_v6 = vld [vmem:[#allocation2 + $0x50] sm:$0xff] }
  0x3c   :  { %v316_v21 = vsub.f32 %v148_v56, %v302_v11  ;;  %v234_v22 = vsel %vm602_vm4, %v231_v52, %v228_v12  ;;  %v289_v23 = vmax.f32 %v171_v18, -100.0  ;;  %v124_v24 = vmul.f32 0.6931472, %v428_v14  ;;  %v430_v25 = vpop.eup %429 }
  0x3d   :  { %v296_v27 = vmax.f32 %v234_v22, -100.0  ;;  %v432_v32 = vpop.eup %431  ;;  %v323_v33 = vmul.f32 %v309_v16, %v99_v15  ;;  %v174_v35 = vmul.f32 0.6931472, %v430_v25  ;;  %v136_v39 = vmax.f32 %v110_v19, -100.0  ;;  %v95_v22 = vld [vmem:[#allocation5 + $0x10] sm:$0xff] }
  0x3e   :  { %v303_v34 = vsub.f32 %v135_v8, %v289_v23  ;;  %v330_v37 = vmul.f32 %v316_v21, %v106_v20  ;;  %v237_v40 = vmul.f32 0.6931472, %v432_v32  ;;  %v434_v41 = vpop.eup %433  ;;  %v143_v43 = vmax.f32 %v124_v24, -100.0 }
  0x3f   :  { %v310_v38 = vsub.f32 %v142_v17, %v296_v27  ;;  %v180_v44 = vsel %vm606_vm5, %v177_v61, %v174_v35  ;;  %v112_v52 = vmul.f32 0.6931472, %v434_v41  ;;  %v337_v53 = vadd.f32 %v323_v33, %v295_v7  ;;  %v81_v7 = vld [vmem:[#allocation2 + $0x20] sm:$0xff]  ;;  %v88_v17 = vld [vmem:[#allocation2 + $0x58] sm:$0xff] }
  0x40   :  { %v317_v42 = vmul.f32 %v303_v34, %v93_v26  ;;  %v243_v46 = vsel %vm610_vm6, %v240_v28, %v237_v40  ;;  %v290_v47 = vmax.f32 %v180_v44, -100.0  ;;  %v186_v57 = vmul.f32 %v185_v36, %v600_v48 }
  0x41   :  { %v324_v45 = vmul.f32 %v310_v38, %v100_v29  ;;  %v297_v51 = vmax.f32 %v243_v46, -100.0  ;;  %v344_v58 = vadd.f32 %v330_v37, %v302_v11  ;;  %vm634_vm7 = vcmp.lt.f32.partialorder %v187_v30, 0.0004427343 }
  0x42   :  { %v331_v49 = vadd.f32 %v317_v42, %v289_v23  ;;  %v304_v56 = vsub.f32 %v136_v39, %v290_v47  ;;  %v436_v59 = vpop.eup %435  ;;  %439 = vlog2.f32 %v244_v31  ;;  %v247_v1 = vmul.f32 -0.5, %v616_v3 }
  0x43   :  { %v338_v54 = vadd.f32 %v324_v45, %v296_v27  ;;  %v311_v60 = vsub.f32 %v143_v43, %v297_v51  ;;  %v183_v0 = vmul.f32 0.6931472, %v436_v59  ;;  %v137_v5 = vmax.f32 %v112_v52, -100.0  ;;  %v438_v48 = vpop.eup %437 }
  0x44   :  { %v318_v63 = vmul.f32 %v304_v56, %v94_v50  ;;  %441 = vlog2.f32 %v80_v2  ;;  %v352_v10 = vsel %vm72_vm0, %v337_v53, 0.0  ;;  %v353_v11 = vsel %vm72_vm0, %v344_v58, 0.0  ;;  %v82_v53 = vld [vmem:[#allocation2 + $0x28] sm:$0xff]  ;;  %v368_v58 = vld [vmem:[#allocation7 + $0x30] sm:$0xff] }
  0x45   :  { %v345_v62 = vadd.f32 %v338_v54, %v331_v49  ;;  %v325_v4 = vmul.f32 %v311_v60, %v101_v55  ;;  %v189_v9 = vsel %vm634_vm7, %v186_v57, %v183_v0  ;;  %443 = vlog2.f32 %v87_v6  ;;  %v102_v49 = vld [vmem:[#allocation5 + $0x48] sm:$0xff]  ;;  %v89_v54 = vld [vmem:[#allocation2 + $0x60] sm:$0xff] }
  0x46   :  { %v332_v8 = vadd.f32 %v318_v63, %v290_v47  ;;  %v291_v13 = vmax.f32 %v189_v9, -100.0  ;;  %v248_v14 = vadd.f32 1.0, %v247_v1  ;;  %v152_v15 = vsub.f32 0.0, %v80_v2 }
  0x47   :  { %v339_v12 = vadd.f32 %v325_v4, %v297_v51  ;;  %376 = vst [vmem:[#allocation7] sm:$0xff] %v345_v62  ;;  %v159_v16 = vsub.f32 0.0, %v87_v6  ;;  %v153_v18 = vsub.f32 0.0, %v81_v7  ;;  %v250_v20 = vand.u32 2147483647, %v616_v3 }
  0x48   :  { %v305_v21 = vsub.f32 %v137_v5, %v291_v13  ;;  %445 = vlog2.f32 %v81_v7  ;;  %v190_v23 = vadd.f32 1.0, %v152_v15  ;;  %v193_v24 = vmul.f32 -0.5, %v152_v15 }
  0x49   :  { %v346_v19 = vadd.f32 %v339_v12, %v332_v8  ;;  %v253_v25 = vadd.f32 1.0, %v159_v16  ;;  %447 = vlog2.f32 %v88_v17  ;;  %v126_v26 = vmul.f32 0.6931472, %v438_v48 }
  0x4a   :  { %v256_v27 = vmul.f32 -0.5, %v159_v16  ;;  %v644_v28 = vsub.f32 0.0, %v88_v17  ;;  %v249_v30 = vmul.f32 %v248_v14, %v616_v3  ;;  %449 = vlog2.f32 %v190_v23 }
  0x4b   :  { %v196_v32 = vand.u32 2147483647, %v152_v15  ;;  %v199_v33 = vadd.f32 1.0, %v153_v18  ;;  %377 = vst [vmem:[#allocation7 + $0x8] sm:$0xff] %v346_v19  ;;  %vm647_vm8 = vcmp.lt.f32.partialorder %v250_v20, 0.0004427343  ;;  %v319_v35 = vmul.f32 %v305_v21, %v95_v22 }
  0x4c   :  { %v440_v29 = vpop.eup %439  ;;  %451 = vlog2.f32 %v253_v25  ;;  %v259_v36 = vand.u32 2147483647, %v159_v16  ;;  %v194_v38 = vadd.f32 1.0, %v193_v24  ;;  %v202_v39 = vmul.f32 -0.5, %v153_v18 }
  0x4d   :  { %v246_v37 = vmul.f32 0.6931472, %v440_v29  ;;  %453 = vlog2.f32 %v199_v33  ;;  %v354_v41 = vadd.f32 %v353_v11, %v352_v10  ;;  %v144_v42 = vmax.f32 %v126_v26, -100.0  ;;  %v96_v33 = vld [vmem:[#allocation5 + $0x18] sm:$0xff] }
  0x4e   :  { %v442_v40 = vpop.eup %441  ;;  %v257_v3 = vadd.f32 1.0, %v256_v27  ;;  %v262_v43 = vadd.f32 1.0, %v644_v28  ;;  %vm654_vm9 = vcmp.lt.f32.partialorder %v196_v32, 0.0004427343  ;;  %v205_v47 = vand.u32 2147483647, %v153_v18 }
  0x4f   :  { %v444_v44 = vpop.eup %443  ;;  %v252_v31 = vsel %vm647_vm8, %v249_v30, %v246_v37  ;;  %v114_v45 = vmul.f32 0.6931472, %v442_v40  ;;  %v333_v51 = vadd.f32 %v319_v35, %v291_v13  ;;  %v203_v52 = vadd.f32 1.0, %v202_v39 }
  0x50   :  { %v298_v50 = vmax.f32 %v252_v31, -100.0  ;;  %455 = vlog2.f32 %v262_v43  ;;  %v128_v55 = vmul.f32 0.6931472, %v444_v44  ;;  %v195_v56 = vmul.f32 %v194_v38, %v152_v15 }
  0x51   :  { %vm658_vm10 = vcmp.lt.f32.partialorder %v259_v36, 0.0004427343  ;;  %v265_v59 = vmul.f32 -0.5, %v644_v28  ;;  %v258_v62 = vmul.f32 %v257_v3, %v159_v16  ;;  %v268_v63 = vand.u32 2147483647, %v644_v28  ;;  %v103_v36 = vld [vmem:[#allocation5 + $0x50] sm:$0xff] }
  0x52   :  { %v446_v60 = vpop.eup %445  ;;  %v312_v61 = vsub.f32 %v144_v42, %v298_v50  ;;  %457 = vlog2.f32 %v82_v53  ;;  %v138_v1 = vmax.f32 %v114_v45, -100.0  ;;  %vm664_vm11 = vcmp.lt.f32.partialorder %v205_v47, 0.0004427343  ;;  %v97_v3 = vld [vmem:[#allocation5 + $0x20] sm:$0xff] }
  0x53   :  { %v448_v0 = vpop.eup %447  ;;  %459 = vlog2.f32 %v89_v54  ;;  %v154_v4 = vsub.f32 0.0, %v82_v53  ;;  %v204_v6 = vmul.f32 %v203_v52, %v153_v18  ;;  %v161_v7 = vsub.f32 0.0, %v89_v54  ;;  %v104_v53 = vld [vmem:[#allocation5 + $0x58] sm:$0xff] }
  0x54   :  { %v326_v5 = vmul.f32 %v312_v61, %v102_v49  ;;  %v375_v48 = vadd.f32 %v368_v58, %v354_v41  ;;  %v450_v8 = vpop.eup %449  ;;  %v145_v9 = vmax.f32 %v128_v55, -100.0  ;;  %v116_v10 = vmul.f32 0.6931472, %v446_v60 }
  0x55   :  { %v266_v11 = vadd.f32 1.0, %v265_v59  ;;  %v208_v12 = vadd.f32 1.0, %v154_v4  ;;  %v192_v15 = vmul.f32 0.6931472, %v450_v8  ;;  %v130_v16 = vmul.f32 0.6931472, %v448_v0 }
  0x56   :  { %v452_v13 = vpop.eup %451  ;;  %v340_v14 = vadd.f32 %v326_v5, %v298_v50  ;;  %v271_v17 = vadd.f32 1.0, %v161_v7  ;;  %382 = vst.msk [vmem:[#allocation7 + $0x30] sm:$0xff] %vm72_vm0, %v375_v48  ;;  %v211_v21 = vmul.f32 -0.5, %v154_v4  ;;  %v274_v22 = vmul.f32 -0.5, %v161_v7 }
  0x57   :  { %v454_v19 = vpop.eup %453  ;;  %v255_v20 = vmul.f32 0.6931472, %v452_v13  ;;  %461 = vlog2.f32 %v208_v12  ;;  %v198_v23 = vsel %vm654_vm9, %v195_v56, %v192_v15  ;;  %v139_v27 = vmax.f32 %v116_v10, -100.0  ;;  %v98_v12 = vld [vmem:[#allocation5 + $0x28] sm:$0xff] }
  0x58   :  { %v347_v18 = vadd.f32 %v340_v14, %v333_v51  ;;  %v201_v24 = vmul.f32 0.6931472, %v454_v19  ;;  %463 = vlog2.f32 %v271_v17  ;;  %v292_v26 = vmax.f32 %v198_v23, -100.0  ;;  %v105_v14 = vld [vmem:[#allocation5 + $0x60] sm:$0xff] }
  0x59   :  { %v261_v25 = vsel %vm658_vm10, %v258_v62, %v255_v20  ;;  %v267_v30 = vmul.f32 %v266_v11, %v644_v28  ;;  %vm676_vm12 = vcmp.lt.f32.partialorder %v268_v63, 0.0004427343  ;;  %v146_v38 = vmax.f32 %v130_v16, -100.0 }
  0x5a   :  { %v456_v32 = vpop.eup %455  ;;  %v299_v29 = vmax.f32 %v261_v25, -100.0  ;;  %v207_v34 = vsel %vm664_vm11, %v204_v6, %v201_v24  ;;  %v306_v37 = vsub.f32 %v138_v1, %v292_v26  ;;  %378 = vst [vmem:[#allocation7 + $0x10] sm:$0xff] %v347_v18  ;;  %v212_v28 = vadd.f32 1.0, %v211_v21 }
  0x5b   :  { %v264_v39 = vmul.f32 0.6931472, %v456_v32  ;;  %v293_v40 = vmax.f32 %v207_v34, -100.0  ;;  %v214_v43 = vand.u32 2147483647, %v154_v4  ;;  %v275_v44 = vadd.f32 1.0, %v274_v22 }
  0x5c   :  { %v458_v41 = vpop.eup %457  ;;  %v313_v42 = vsub.f32 %v145_v9, %v299_v29  ;;  %v320_v45 = vmul.f32 %v306_v37, %v96_v33  ;;  %v277_v49 = vand.u32 2147483647, %v161_v7  ;;  %v213_v58 = vmul.f32 %v212_v28, %v154_v4 }
  0x5d   :  { %v460_v31 = vpop.eup %459  ;;  %v270_v46 = vsel %vm676_vm12, %v267_v30, %v264_v39  ;;  %v307_v47 = vsub.f32 %v139_v27, %v293_v40  ;;  %v118_v55 = vmul.f32 0.6931472, %v458_v41  ;;  %vm215_vm13 = vcmp.lt.f32.partialorder %v214_v43, 0.0004427343 }
  0x5e   :  { %v327_v50 = vmul.f32 %v313_v42, %v103_v36  ;;  %v300_v51 = vmax.f32 %v270_v46, -100.0  ;;  %v334_v52 = vadd.f32 %v320_v45, %v292_v26  ;;  %v132_v59 = vmul.f32 0.6931472, %v460_v31 }
  0x5f   :  { %v321_v54 = vmul.f32 %v307_v47, %v97_v3  ;;  %v276_v61 = vmul.f32 %v275_v44, %v161_v7  ;;  %vm682_vm14 = vcmp.lt.f32.partialorder %v277_v49, 0.0004427343  ;;  %v140_v6 = vmax.f32 %v118_v55, -100.0 }
  0x60   :  { %v341_v56 = vadd.f32 %v327_v50, %v299_v29  ;;  %v314_v57 = vsub.f32 %v146_v38, %v300_v51  ;;  %v147_v9 = vmax.f32 %v132_v59, -100.0 }
  0x61   :  { %v462_v60 = vpop.eup %461  ;;  %v335_v2 = vadd.f32 %v321_v54, %v293_v40 }
  0x62   :  { %v464_v63 = vpop.eup %463  ;;  %v348_v0 = vadd.f32 %v341_v56, %v334_v52  ;;  %v328_v1 = vmul.f32 %v314_v57, %v104_v53  ;;  %v210_v5 = vmul.f32 0.6931472, %v462_v60 }
  0x63   :  { %v273_v48 = vmul.f32 0.6931472, %v464_v63 }
  0x64   :  { %v342_v8 = vadd.f32 %v328_v1, %v300_v51  ;;  %v216_v10 = vsel %vm215_vm13, %v213_v58, %v210_v5  ;;  %379 = vst [vmem:[#allocation7 + $0x18] sm:$0xff] %v348_v0 }
  0x65   :  { %v279_v4 = vsel %vm682_vm14, %v276_v61, %v273_v48  ;;  %v294_v11 = vmax.f32 %v216_v10, -100.0 }
  0x66   :  { %v349_v7 = vadd.f32 %v342_v8, %v335_v2  ;;  %v301_v13 = vmax.f32 %v279_v4, -100.0 }
  0x67   :  { %v308_v15 = vsub.f32 %v140_v6, %v294_v11 }
  0x68   :  { %v315_v16 = vsub.f32 %v147_v9, %v301_v13  ;;  %380 = vst [vmem:[#allocation7 + $0x20] sm:$0xff] %v349_v7 }
  0x69   :  { %v322_v17 = vmul.f32 %v308_v15, %v98_v12 }
  0x6a   :  { %v329_v19 = vmul.f32 %v315_v16, %v105_v14 }
  0x6b   :  { %v336_v20 = vadd.f32 %v322_v17, %v294_v11 }
  0x6c   :  { %v343_v21 = vadd.f32 %v329_v19, %v301_v13 }
  0x6e   :  { %v350_v22 = vadd.f32 %v343_v21, %v336_v20 }
  0x70   :  { %381 = vst [vmem:[#allocation7 + $0x28] sm:$0xff] %v350_v22 }
  0x71   :  { %520 = shalt.err (!%p517_p6)
}
  0x72   :  { %s521_s10 = scalar_lea.hbm %s702_s2, 896 }
  0x73   :  { %p522_p7 = scmp.ne.s32.totalorder %s702_s2, %s521_s10  ;;  %p525_p8 = scmp.lt.u32.totalorder %s521_s10, %s702_s2 }
  0x75   :  { %p527_p9 = pnand %p525_p8, %p522_p7 }
  0x77   :  { %530 = shalt.err (!%p527_p9)
}
  0x78   :  { %392 = dma.vmem_to_hbm [thread:$0]  %s390_s6, 896, %s702_s2, [#allocation4]  }
  0x79   :  { %535 = dma.done.wait [#allocation4], 896  }
  0x7a   :  { %536 = vsyncadd [#allocation4], 4294966400 }
  0x7b   :  { %396 = vsyncpa [#allocation3], 1 }
  0x7c   :  { %397 = vsyncpa [#allocation6], 1 }
  0x7d   :  { %398 = vsyncpa [#allocation4], 1 }

</bundles_post_ra>
